<compile_context>
chip_gen: v7x
topology: tpu7x:2x2x1
jax: 0.10.0
libtpu: 0.0.40
codegen_flags: <defaults>
</compile_context>

<pallas_src>
import jax
import jax.numpy as jnp
from jax.experimental import pallas as pl
from jax.experimental.pallas import tpu as pltpu


def att1_kernel(v_ref, q1_ref, e_ref, et_ref, m_ref,
                w1v_ref, w2_ref, b2_ref, w3_ref, out_ref):
    f32 = jnp.float32
    cdt = w2_ref.dtype  # matmul-input ("compute") dtype: f32 or bf16

    # ---- layer 1: relu(v @ W1v + E @ q1)   (q1 already includes b1) --------
    # v_ref:  [TB*K, Vd]   q1_ref: [TB, H]   e_ref: [TB*K, TB] 0/1 expander
    h1 = jnp.dot(v_ref[...], w1v_ref[...], preferred_element_type=f32)
    h1 = h1 + jnp.dot(e_ref[...], q1_ref[...], preferred_element_type=f32)
    h1 = jnp.maximum(h1, 0.0)

    # ---- layer 2: relu(h1 @ W2 + b2) ----------------------------------------
    h2 = jnp.dot(h1.astype(cdt), w2_ref[...], preferred_element_type=f32)
    h2 = jnp.maximum(h2 + b2_ref[...], 0.0)

    # ---- final projection -> [TB*K, 1] column of logits (b3 dropped) --------
    col = jnp.dot(h2.astype(cdt), w3_ref[...], preferred_element_type=f32)

    # ---- lane-dense rearrange [TB*K, 1] -> [TB, K] via 0/1 selection matmul --
    # m_ref[i, k] = 1 iff row i is object k of its batch element,
    # et_ref[t, i] = 1 iff row i belongs to batch element t.
    logits = jnp.dot(et_ref[...], col * m_ref[...], preferred_element_type=f32)

    # ---- softmax over K (lane axis) ------------------------------------------
    mx = jnp.max(logits, axis=-1, keepdims=True)
    ex = jnp.exp(logits - mx)
    denom = jnp.sum(ex, axis=-1, keepdims=True)
    out_ref[...] = (ex * pl.reciprocal(denom, approx=True)).astype(out_ref.dtype)


def _round_up(x, m):
    return ((x + m - 1) // m) * m


def att1_forward(v, q, params, *, tb=None, compute_dtype=jnp.float32):
    B, K, Vd = v.shape
    H = params["w1v"].shape[1]

    # Hoisted query projection (one full-batch XLA matmul); b1 folded in.
    q1 = (q.astype(jnp.float32) @ params["w1q"].astype(jnp.float32)
          + params["b1"]).astype(jnp.float32)                      # [B, H]

    # Batch tile: aim for ~256 MXU rows per grid step; keep TB a multiple of 8
    # so every block's sublane dim is aligned.
    if tb is None:
        tb = max(1, 256 // K)
    tb = max(8, _round_up(int(tb), 8))
    Bp = _round_up(B, tb)
    if Bp != B:
        v = jnp.pad(v, ((0, Bp - B), (0, 0), (0, 0)))
        q1 = jnp.pad(q1, ((0, Bp - B), (0, 0)))
    tbk = tb * K

    # Flatten (batch, k) into MXU rows outside the kernel (free XLA reshape).
    v2 = v.reshape(Bp * K, Vd).astype(compute_dtype)

    # Constant 0/1 selection matrices (resident in VMEM across the grid).
    ridx = jnp.arange(tbk, dtype=jnp.int32)
    e_mat = (ridx[:, None] // K ==
             jnp.arange(tb, dtype=jnp.int32)[None, :]).astype(jnp.float32)   # [tbk, tb]
    et_mat = e_mat.T                                                          # [tb, tbk]
    m_mat = (ridx[:, None] % K ==
             jnp.arange(K, dtype=jnp.int32)[None, :]).astype(jnp.float32)     # [tbk, K]

    w1v = params["w1v"].astype(compute_dtype)
    w2 = params["w2"].astype(compute_dtype)
    b2 = params["b2"].astype(jnp.float32)
    w3 = params["w3"].astype(compute_dtype)
    # b3 is intentionally not passed: softmax over K is invariant to it.

    def full(arr):
        nd = arr.ndim
        return pl.BlockSpec(arr.shape, lambda b, _nd=nd: (0,) * _nd)

    out = pl.pallas_call(
        att1_kernel,
        out_shape=jax.ShapeDtypeStruct((Bp, K), jnp.float32),
        grid_spec=pltpu.PrefetchScalarGridSpec(
            num_scalar_prefetch=0,
            grid=(Bp // tb,),
            in_specs=[
                pl.BlockSpec((tbk, Vd), lambda b: (b, 0)),   # v rows
                pl.BlockSpec((tb, H), lambda b: (b, 0)),     # hoisted q1 rows
                full(e_mat), full(et_mat), full(m_mat),      # selection consts
                full(w1v), full(w2), full(b2), full(w3),     # resident weights
            ],
            out_specs=pl.BlockSpec((tb, K), lambda b: (b, 0)),
        ),
        compiler_params=pltpu.CompilerParams(
            dimension_semantics=("parallel",),
            vmem_limit_bytes=32 * 1024 * 1024,
        ),
    )(v2, q1, e_mat, et_mat, m_mat, w1v, w2, b2, w3)

    return out[:B].reshape(B, K, 1)


def _weight_norm_eff(raw_w):
    # PyTorch weight_norm(dim=None): W = g * V / ||V||_F, with g initialized to
    # ||V||_F -> effective weight equals V at init; formula kept for intent.
    g = jnp.linalg.norm(raw_w)
    return g * raw_w / jnp.linalg.norm(raw_w)


def make_params(key, v_dim, q_dim, num_hid):
    ks = jax.random.split(key, 6)
    # raw weights stored PyTorch-style [out, in]; folded + transposed to [in, out]
    w1_raw = jax.random.normal(ks[0], (num_hid, v_dim + q_dim), jnp.float32) * 0.1
    b1 = jax.random.normal(ks[1], (1, num_hid), jnp.float32) * 0.1
    w2_raw = jax.random.normal(ks[2], (num_hid, num_hid), jnp.float32) * 0.1
    b2 = jax.random.normal(ks[3], (1, num_hid), jnp.float32) * 0.1
    w3_raw = jax.random.normal(ks[4], (1, num_hid), jnp.float32) * 0.1
    b3 = jax.random.normal(ks[5], (1, 1), jnp.float32) * 0.1

    w1 = _weight_norm_eff(w1_raw).T          # [v_dim+q_dim, H]
    w2 = _weight_norm_eff(w2_raw).T          # [H, H]
    w3 = _weight_norm_eff(w3_raw).T          # [H, 1]
    return {
        "w1v": w1[:v_dim, :],                # [v_dim, H]
        "w1q": w1[v_dim:, :],                # [q_dim, H]
        "b1": b1,
        "w2": w2,
        "b2": b2,
        "w3": w3,
        "b3": b3,
    }


def att1_reference(v, q, p):
    hi = jax.lax.Precision.HIGHEST
    B, K, _ = v.shape
    qr = jnp.broadcast_to(q[:, None, :], (B, K, q.shape[-1]))
    vq = jnp.concatenate([v, qr], axis=2)
    w1 = jnp.concatenate([p["w1v"], p["w1q"]], axis=0)
    h1 = jax.nn.relu(jnp.einsum("bkd,dh->bkh", vq, w1, precision=hi) + p["b1"])
    h2 = jax.nn.relu(jnp.einsum("bkh,hj->bkj", h1, p["w2"], precision=hi) + p["b2"])
    logits = jnp.einsum("bkh,hj->bkj", h2, p["w3"], precision=hi) + p["b3"]
    return jax.nn.softmax(logits, axis=1)


if __name__ == "__main__":
    B, K, V_DIM, Q_DIM, NUM_HID = 16, 8, 16, 16, 32

    key = jax.random.PRNGKey(0)
    kv, kq, kp = jax.random.split(key, 3)
    v = jax.random.normal(kv, (B, K, V_DIM), jnp.float32)
    q = jax.random.normal(kq, (B, Q_DIM), jnp.float32)
    params = make_params(kp, V_DIM, Q_DIM, NUM_HID)

    ref = att1_reference(v, q, params)

    # f32 path, explicit tb=8 -> grid of 2 steps (exercises the index maps).
    out_f32 = jax.block_until_ready(att1_forward(v, q, params, tb=8))
    assert out_f32.shape == (B, K, 1)
    assert jnp.allclose(out_f32, ref, atol=3e-3), float(jnp.max(jnp.abs(out_f32 - ref)))

    # bf16 weights/activations with f32 accumulation, auto batch tile (with padding).
    out_bf16 = jax.block_until_ready(
        att1_forward(v, q, params, compute_dtype=jnp.bfloat16))
    assert out_bf16.shape == (B, K, 1)
    assert jnp.allclose(out_bf16, ref, atol=2e-2), float(jnp.max(jnp.abs(out_bf16 - ref)))

    print("KERNEL_OK")
</pallas_src>

<mosaic_0001>
module attributes {stable_mosaic.version = 11 : i64} {
  func.func @att1_kernel(%arg0: i32, %arg1: memref<64x16xf32, #tpu.memory_space<vmem>>, %arg2: memref<8x32xf32, #tpu.memory_space<vmem>>, %arg3: memref<64x8xf32, #tpu.memory_space<vmem>>, %arg4: memref<8x64xf32, #tpu.memory_space<vmem>>, %arg5: memref<64x8xf32, #tpu.memory_space<vmem>>, %arg6: memref<16x32xf32, #tpu.memory_space<vmem>>, %arg7: memref<32x32xf32, #tpu.memory_space<vmem>>, %arg8: memref<1x32xf32, #tpu.memory_space<vmem>>, %arg9: memref<32x1xf32, #tpu.memory_space<vmem>>, %arg10: memref<8x8xf32, #tpu.memory_space<vmem>>) attributes {dimension_semantics = [#tpu.dimension_semantics<parallel>], iteration_bounds = array<i64: 2>, scalar_prefetch = 0 : i64, scratch_operands = 0 : i64, tpu.core_type = #tpu.core_type<tc>, window_params = [{transform_indices = @transform_0, window_bounds = array<i64: 64, 16>}, {transform_indices = @transform_1, window_bounds = array<i64: 8, 32>}, {pipeline_mode = #tpu.pipeline_mode<synchronous>, transform_indices = @transform_2, window_bounds = array<i64: 64, 8>}, {pipeline_mode = #tpu.pipeline_mode<synchronous>, transform_indices = @transform_3, window_bounds = array<i64: 8, 64>}, {pipeline_mode = #tpu.pipeline_mode<synchronous>, transform_indices = @transform_4, window_bounds = array<i64: 64, 8>}, {pipeline_mode = #tpu.pipeline_mode<synchronous>, transform_indices = @transform_5, window_bounds = array<i64: 16, 32>}, {pipeline_mode = #tpu.pipeline_mode<synchronous>, transform_indices = @transform_6, window_bounds = array<i64: 32, 32>}, {pipeline_mode = #tpu.pipeline_mode<synchronous>, transform_indices = @transform_7, window_bounds = array<i64: 1, 32>}, {pipeline_mode = #tpu.pipeline_mode<synchronous>, transform_indices = @transform_8, window_bounds = array<i64: 32, 1>}, {transform_indices = @transform_9, window_bounds = array<i64: 8, 8>}]} {
    %c0 = arith.constant 0 : index
    %c0_0 = arith.constant 0 : index
    %0 = vector.load %arg1[%c0, %c0_0] : memref<64x16xf32, #tpu.memory_space<vmem>>, vector<64x16xf32>
    %c0_1 = arith.constant 0 : index
    %c0_2 = arith.constant 0 : index
    %1 = vector.load %arg6[%c0_1, %c0_2] : memref<16x32xf32, #tpu.memory_space<vmem>>, vector<16x32xf32>
    %cst = arith.constant dense<0.000000e+00> : vector<64x32xf32>
    %2 = tpu.matmul %0, %1, %cst {dimension_numbers = #tpu.dot_dimension_numbers<[1], [0], [0], [1], [0, 0, 1, 1], [], []>} : vector<64x16xf32>, vector<16x32xf32>, vector<64x32xf32> -> vector<64x32xf32>
    %c0_3 = arith.constant 0 : index
    %c0_4 = arith.constant 0 : index
    %3 = vector.load %arg3[%c0_3, %c0_4] : memref<64x8xf32, #tpu.memory_space<vmem>>, vector<64x8xf32>
    %c0_5 = arith.constant 0 : index
    %c0_6 = arith.constant 0 : index
    %4 = vector.load %arg2[%c0_5, %c0_6] : memref<8x32xf32, #tpu.memory_space<vmem>>, vector<8x32xf32>
    %cst_7 = arith.constant dense<0.000000e+00> : vector<64x32xf32>
    %5 = tpu.matmul %3, %4, %cst_7 {dimension_numbers = #tpu.dot_dimension_numbers<[1], [0], [0], [1], [0, 0, 1, 1], [], []>} : vector<64x8xf32>, vector<8x32xf32>, vector<64x32xf32> -> vector<64x32xf32>
    %6 = arith.addf %2, %5 : vector<64x32xf32>
    %cst_8 = arith.constant 0.000000e+00 : f32
    %7 = vector.broadcast %cst_8 : f32 to vector<64x32xf32>
    %8 = arith.maximumf %6, %7 : vector<64x32xf32>
    %c0_9 = arith.constant 0 : index
    %c0_10 = arith.constant 0 : index
    %9 = vector.load %arg7[%c0_9, %c0_10] : memref<32x32xf32, #tpu.memory_space<vmem>>, vector<32x32xf32>
    %cst_11 = arith.constant dense<0.000000e+00> : vector<64x32xf32>
    %10 = tpu.matmul %8, %9, %cst_11 {dimension_numbers = #tpu.dot_dimension_numbers<[1], [0], [0], [1], [0, 0, 1, 1], [], []>} : vector<64x32xf32>, vector<32x32xf32>, vector<64x32xf32> -> vector<64x32xf32>
    %c0_12 = arith.constant 0 : index
    %c0_13 = arith.constant 0 : index
    %11 = vector.load %arg8[%c0_12, %c0_13] : memref<1x32xf32, #tpu.memory_space<vmem>>, vector<1x32xf32>
    %12 = vector.broadcast %11 : vector<1x32xf32> to vector<64x32xf32>
    %13 = arith.addf %10, %12 : vector<64x32xf32>
    %cst_14 = arith.constant 0.000000e+00 : f32
    %14 = vector.broadcast %cst_14 : f32 to vector<64x32xf32>
    %15 = arith.maximumf %13, %14 : vector<64x32xf32>
    %c0_15 = arith.constant 0 : index
    %c0_16 = arith.constant 0 : index
    %16 = vector.load %arg9[%c0_15, %c0_16] : memref<32x1xf32, #tpu.memory_space<vmem>>, vector<32x1xf32>
    %cst_17 = arith.constant dense<0.000000e+00> : vector<64x1xf32>
    %17 = tpu.matmul %15, %16, %cst_17 {dimension_numbers = #tpu.dot_dimension_numbers<[1], [0], [0], [1], [0, 0, 1, 1], [], []>} : vector<64x32xf32>, vector<32x1xf32>, vector<64x1xf32> -> vector<64x1xf32>
    %c0_18 = arith.constant 0 : index
    %c0_19 = arith.constant 0 : index
    %18 = vector.load %arg4[%c0_18, %c0_19] : memref<8x64xf32, #tpu.memory_space<vmem>>, vector<8x64xf32>
    %c0_20 = arith.constant 0 : index
    %c0_21 = arith.constant 0 : index
    %19 = vector.load %arg5[%c0_20, %c0_21] : memref<64x8xf32, #tpu.memory_space<vmem>>, vector<64x8xf32>
    %20 = vector.broadcast %17 : vector<64x1xf32> to vector<64x8xf32>
    %21 = arith.mulf %20, %19 : vector<64x8xf32>
    %cst_22 = arith.constant dense<0.000000e+00> : vector<8x8xf32>
    %22 = tpu.matmul %18, %21, %cst_22 {dimension_numbers = #tpu.dot_dimension_numbers<[1], [0], [0], [1], [0, 0, 1, 1], [], []>} : vector<8x64xf32>, vector<64x8xf32>, vector<8x8xf32> -> vector<8x8xf32>
    %cst_23 = arith.constant dense<0xFF800000> : vector<8xf32>
    %23 = vector.multi_reduction <maximumf>, %22, %cst_23 [1] : vector<8x8xf32> to vector<8xf32>
    %24 = vector.shape_cast %23 : vector<8xf32> to vector<8x1xf32>
    %25 = vector.broadcast %24 : vector<8x1xf32> to vector<8x8xf32>
    %26 = arith.subf %22, %25 : vector<8x8xf32>
    %27 = math.exp %26 : vector<8x8xf32>
    %cst_24 = arith.constant dense<0.000000e+00> : vector<8xf32>
    %28 = vector.multi_reduction <add>, %27, %cst_24 [1] : vector<8x8xf32> to vector<8xf32>
    %29 = vector.shape_cast %28 : vector<8xf32> to vector<8x1xf32>
    %30 = tpu.reciprocal %29 {approx = true} : vector<8x1xf32> -> vector<8x1xf32>
    %31 = vector.broadcast %30 : vector<8x1xf32> to vector<8x8xf32>
    %32 = arith.mulf %27, %31 : vector<8x8xf32>
    %c0_25 = arith.constant 0 : index
    %c0_26 = arith.constant 0 : index
    %33 = vector.load %arg10[%c0_25, %c0_26] : memref<8x8xf32, #tpu.memory_space<vmem>>, vector<8x8xf32>
    tpu.vector_store %arg10[%c0_25, %c0_26], %32 {strides = array<i32>} : memref<8x8xf32, #tpu.memory_space<vmem>>, vector<8x8xf32>,
    return
  }
  func.func @transform_0(%arg0: i32) -> (i32, i32) {
    %c0_i32 = arith.constant 0 : i32
    %c0_i32_0 = arith.constant 0 : i32
    return %arg0, %c0_i32 : i32, i32
  }
  func.func @transform_1(%arg0: i32) -> (i32, i32) {
    %c0_i32 = arith.constant 0 : i32
    %c0_i32_0 = arith.constant 0 : i32
    return %arg0, %c0_i32 : i32, i32
  }
  func.func @transform_2(%arg0: i32) -> (i32, i32) {
    %c0_i32 = arith.constant 0 : i32
    %c0_i32_0 = arith.constant 0 : i32
    %c0_i32_1 = arith.constant 0 : i32
    return %c0_i32, %c0_i32_0 : i32, i32
  }
  func.func @transform_3(%arg0: i32) -> (i32, i32) {
    %c0_i32 = arith.constant 0 : i32
    %c0_i32_0 = arith.constant 0 : i32
    %c0_i32_1 = arith.constant 0 : i32
    return %c0_i32, %c0_i32_0 : i32, i32
  }
  func.func @transform_4(%arg0: i32) -> (i32, i32) {
    %c0_i32 = arith.constant 0 : i32
    %c0_i32_0 = arith.constant 0 : i32
    %c0_i32_1 = arith.constant 0 : i32
    return %c0_i32, %c0_i32_0 : i32, i32
  }
  func.func @transform_5(%arg0: i32) -> (i32, i32) {
    %c0_i32 = arith.constant 0 : i32
    %c0_i32_0 = arith.constant 0 : i32
    %c0_i32_1 = arith.constant 0 : i32
    return %c0_i32, %c0_i32_0 : i32, i32
  }
  func.func @transform_6(%arg0: i32) -> (i32, i32) {
    %c0_i32 = arith.constant 0 : i32
    %c0_i32_0 = arith.constant 0 : i32
    %c0_i32_1 = arith.constant 0 : i32
    return %c0_i32, %c0_i32_0 : i32, i32
  }
  func.func @transform_7(%arg0: i32) -> (i32, i32) {
    %c0_i32 = arith.constant 0 : i32
    %c0_i32_0 = arith.constant 0 : i32
    %c0_i32_1 = arith.constant 0 : i32
    return %c0_i32, %c0_i32_0 : i32, i32
  }
  func.func @transform_8(%arg0: i32) -> (i32, i32) {
    %c0_i32 = arith.constant 0 : i32
    %c0_i32_0 = arith.constant 0 : i32
    %c0_i32_1 = arith.constant 0 : i32
    return %c0_i32, %c0_i32_0 : i32, i32
  }
  func.func @transform_9(%arg0: i32) -> (i32, i32) {
    %c0_i32 = arith.constant 0 : i32
    %c0_i32_0 = arith.constant 0 : i32
    return %arg0, %c0_i32 : i32, i32
  }
}

</mosaic_0001>

<bundles_post_ra>
// kernel: tpu_custom_call.1
= control target key start
LH: loop header
LB: loop body
LE: loop exit
PB: predicated region body
PF: predicated region fallthrough
CT: control target
= control target key end

     0   :  { %s1433_s30 = smov 0   ;;  %s1584_s0 = inlined_call_operand.vmem [shape: f32[128,16], index: 0, kind: input, shape index: {}]   ;;  %s1585_s1 = inlined_call_operand.vmem [shape: f32[16,32], index: 1, kind: input, shape index: {}]   ;;  %s1586_s2 = inlined_call_operand.vmem [shape: f32[64,8], index: 2, kind: input, shape index: {}]   ;;  %s1587_s3 = inlined_call_operand.vmem [shape: f32[8,64], index: 3, kind: input, shape index: {}]   ;;  %s1588_s4 = inlined_call_operand.vmem [shape: f32[64,8], index: 4, kind: input, shape index: {}]   ;;  %s1589_s5 = inlined_call_operand.vmem [shape: f32[16,32], index: 5, kind: input, shape index: {}]   ;;  %s1590_s6 = inlined_call_operand.vmem [shape: f32[32,32], index: 6, kind: input, shape index: {}]   ;;  %s1591_s7 = inlined_call_operand.vmem [shape: f32[1,32], index: 7, kind: input, shape index: {}]   ;;  %s1592_s8 = inlined_call_operand.vmem [shape: f32[32,1], index: 8, kind: input, shape index: {}]   ;;  %s1593_s9 = inlined_call_operand.vmem [shape: f32[16,8], index: 9, kind: output, shape index: {}]  }
   0x1 LB: > { %s1439_s10 = sadd.s32 4294967295, %s1377_s30   ;;  %p1131_p0 = scmp.ge.s32.totalorder %s1377_s30, 1  ;;  %s1377_s30 = sphi %s1433_s30, %s19_s30  }
   0x2   : > { %p297_p1 = scmp.lt.s32.totalorder %s1377_s30, 3 }
   0x4   : > { %p298_p2 = pnand %p1131_p0, %p297_p1 }
   0x5   : > { %p342_p3 = scmp.lt.s32.totalorder (!%p298_p2), %s1439_s10, 1  ;;  %v360_v0 = vld [vmem:[%s1586_s2] sm:$0xff] (!%p298_p2)  ;;  %vm369_vm0 = vcmask (!%p298_p2), 64512   ;;  %s1132_s13 = sshll.u32 (!%p298_p2), %s1439_s10, 3  ;;  %v359_v2 = vld [vmem:[%s1589_s5 + $0x8] sm:$0xff] (!%p298_p2)  ;;  %v362_v9 = vld [vmem:[%s1586_s2 + $0x10] sm:$0xff] (!%p298_p2) }
   0x6   : > { %301 = sbr.rel (%p298_p2) target bundleno = 1360 (0x550), region = 56  ;;  %1226 = vmatprep.mubr.msk.f32.mxu0 (!%p298_p2), %vm369_vm0, %v360_v0  ;;  %v358_v1 = vld [vmem:[%s1589_s5] sm:$0xff] (!%p298_p2)  ;;  %v638_v4 = vld [vmem:[%s1590_s6 + $0x8] sm:$0xff] (!%p298_p2)  ;;  %p337_p4 = scmp.lt.s32.totalorder (!%p298_p2), %s1132_s13, 15  ;;  %v363_v10 = vld [vmem:[%s1586_s2 + $0x18] sm:$0xff] (!%p298_p2)  ;;  %vm499_vm1 = vcmask (!%p298_p2), 130048  }
   0x7   : > { %v637_v3 = vld [vmem:[%s1590_s6] sm:$0xff] (!%p298_p2)  ;;  %v1313_v6 = vpack.c.bf16 (!%p298_p2), %v359_v2, %v358_v1  ;;  %v361_v8 = vld [vmem:[%s1586_s2 + $0x8] sm:$0xff] (!%p298_p2)  ;;  %v366_v13 = vld [vmem:[%s1586_s2 + $0x30] sm:$0xff] (!%p298_p2)  ;;  %vm648_vm2 = vcmask (!%p298_p2), 261120   ;;  %vm1381_vm3 = vmmov (!%p298_p2), 0   ;;  %vm976_vm4 = vcmask (!%p298_p2), 523264  }
   0x8   : > { %v1317_v5 = vpack.c.bf16 (!%p298_p2), %v638_v4, %v637_v3  ;;  %v364_v11 = vld [vmem:[%s1586_s2 + $0x20] sm:$0xff] (!%p298_p2)  ;;  %v365_v12 = vld [vmem:[%s1586_s2 + $0x28] sm:$0xff] (!%p298_p2)  ;;  %v367_v14 = vld [vmem:[%s1586_s2 + $0x38] sm:$0xff] (!%p298_p2) }
   0x9   : > { %v639_v23 = vld [vmem:[%s1590_s6 + $0x10] sm:$0xff] (!%p298_p2)  ;;  %v640_v24 = vld [vmem:[%s1590_s6 + $0x18] sm:$0xff] (!%p298_p2)  ;;  %v786_v26 = vld [vmem:[%s1592_s8] sm:$0xff] (!%p298_p2) }
   0xa   : > { %1318 = vmatprep.subr.bf16.mxu1 (!%p298_p2), %v1317_v5  ;;  %v1321_v25 = vpack.c.bf16 (!%p298_p2), %v640_v24, %v639_v23  ;;  %v787_v27 = vld [vmem:[%s1592_s8 + $0x8] sm:$0xff] (!%p298_p2)  ;;  %v788_v30 = vld [vmem:[%s1592_s8 + $0x10] sm:$0xff] (!%p298_p2)  ;;  %v789_v31 = vld [vmem:[%s1592_s8 + $0x18] sm:$0xff] (!%p298_p2) }
   0xb   : > { %1320 = vmatpush3.bf16.msra.mxu1 (!%p298_p2), %v1317_v5  ;;  %v1325_v28 = vpack.c.bf16 (!%p298_p2), %v787_v27, %v786_v26  ;;  %v1329_v35 = vpack.c.bf16 (!%p298_p2), %v789_v31, %v788_v30  ;;  %v1152_v48 = vld [vmem:[%s1591_s7] ss:$0 sm:$0xff] (!%p298_p2)  ;;  %v923_v26 = vld [vmem:[%s1588_s4 + $0x18] sm:$0xff] (!%p298_p2) }
   0xc   : > { %1322 = vmatprep.subr.bf16.mxu1 (!%p298_p2), %v1321_v25 }
   0xd   : > { %s1595_s10 = smov (!%p342_p3, %s1439_s10), 1  ;;  %s1597_s13 = smov (!%p337_p4, %s1132_s13), 15 }
   0xe   : > { %s1134_s22 = sshll.u32 %s1595_s10, 3  ;;  %s1133_s16 = sshll.u32 %s1597_s13, 3 }
   0xf   : > { %s345_s25 = scalar_lea.vmem %s1585_s1, %s1134_s22  ;;  %s340_s24 = scalar_lea.vmem %s1584_s0, %s1133_s16  ;;  %1324 = vmatpush3.bf16.msra.mxu1 %v1321_v25 }
  0x10   : > { %v368_v7 = vld [vmem:[%s345_s25] sm:$0xff]  ;;  %v351_v16 = vld [vmem:[%s340_s24 + $0x8] sm:$0xff]  ;;  %v352_v17 = vld [vmem:[%s340_s24 + $0x10] sm:$0xff]  ;;  %1326 = vmatprep.subr.bf16.mxu1 %v1325_v28  ;;  %s349_s25 = scalar_lea.vmem %s1593_s9, %s1134_s22 }
  0x11   : > { %1224 = vmatprep.subr.mxu0 %v368_v7  ;;  %v350_v15 = vld [vmem:[%s340_s24] sm:$0xff]  ;;  %v353_v18 = vld [vmem:[%s340_s24 + $0x18] sm:$0xff]  ;;  %v355_v20 = vld [vmem:[%s340_s24 + $0x28] sm:$0xff] }
  0x12   : > { %1225 = vmatpush3.msra.mxu0 %v368_v7  ;;  %v354_v19 = vld [vmem:[%s340_s24 + $0x20] sm:$0xff]  ;;  %v356_v21 = vld [vmem:[%s340_s24 + $0x30] sm:$0xff]  ;;  %v357_v22 = vld [vmem:[%s340_s24 + $0x38] sm:$0xff] }
  0x13   : > { %1227 = vmatmul.mubr.msk.f32.vlgmr.msra.gmra.mrb[0].mxu0 %vm369_vm0, %v361_v8  ;;  %1314 = vmatprep.subr.bf16.mxu0 %v1313_v6 }
  0x14   : > { %1316 = vmatpush3.bf16.msra.mxu0 %v1313_v6  ;;  %1229 = vmatprep.mubr.msk.f32.mxu0 %vm369_vm0, %v362_v9  ;;  %v1379_v9 = vmov 0  }
  0x15   : > { %1365 = vset.pattern.permute.xlu0 %v1379_v9  ;;  %1366 = vset.pattern.permute.xlu1 %v1379_v9 }
  0x17   : > { %1230 = vmatmul.mubr.msk.f32.gmra.mrb[2].mxu0 %vm369_vm0, %v363_v10 }
  0x18   : > { %1232 = vmatprep.mubr.msk.f32.mxu0 %vm369_vm0, %v364_v11 }
  0x1b   : > { %1233 = vmatmul.mubr.msk.f32.gmra.mrb[4].mxu0 %vm369_vm0, %v365_v12 }
  0x1c   : > { %1235 = vmatprep.mubr.msk.f32.mxu0 %vm369_vm0, %v366_v13 }
  0x1f   : > { %1236 = vmatmul.mubr.msk.f32.gmra.mrb[6].mxu0 %vm369_vm0, %v367_v14 }
  0x20   : > { %1242 = vmatprep.mubr.msk.f32.mxu0 %vm499_vm1, %v350_v15 }
  0x23   : > { %1243 = vmatmul.mubr.msk.f32.vlgmr.msra.gmra.mrb[0].mxu0 %vm499_vm1, %v351_v16  ;;  %v1380_v16 = vmov 0.0|0.0  }
  0x24   : > { %1245 = vmatprep.mubr.msk.f32.mxu0 %vm499_vm1, %v352_v17  ;;  %1333 = vmatprep.subr.bf16.mxu0 %v1380_v16 }
  0x27   : > { %1246 = vmatmul.mubr.msk.f32.gmra.mrb[2].mxu0 %vm499_vm1, %v353_v18 }
  0x28   : > { %1248 = vmatprep.mubr.msk.f32.mxu0 %vm499_vm1, %v354_v19  ;;  %v1382_v19 = vmov 0.0  }
  0x2b   : > { %1249 = vmatmul.mubr.msk.f32.gmra.mrb[4].mxu0 %vm499_vm1, %v355_v20 }
  0x2c   : > { %1251 = vmatprep.mubr.msk.f32.mxu0 %vm499_vm1, %v356_v21  ;;  %v920_v21 = vld [vmem:[%s1588_s4] sm:$0xff] }
  0x2f   : > { %1252 = vmatmul.mubr.msk.f32.gmra.mrb[6].mxu0 %vm499_vm1, %v357_v22  ;;  %v921_v22 = vld [vmem:[%s1588_s4 + $0x8] sm:$0xff] }
  0x30   : > { %1310 = vmatprep.mubr.msk.f32.mxu0 %vm1381_vm3, %v1382_v19 }
  0xf6   : > { %v1244_v29 = vpop.f32.mrb[0].mxu0 }
  0xf7   : > { %v590_v32 = vpop.f32.mrb[1].mxu0  ;;  %v630_v34 = vmax.f32 %v1244_v29, 0.0 }
  0xf8   : > { %v629_v33 = vmax.f32 %v590_v32, 0.0 }
  0xfa   : > { %v1247_v36 = vpop.f32.mrb[2].mxu0  ;;  %1262 = vmatprep.mubr.msk.f32.mxu1 %vm648_vm2, %v629_v33 }
  0xfb   : > { %v600_v37 = vpop.f32.mrb[3].mxu0  ;;  %1263 = vmatmul.mubr.msk.f32.vlgmr.msra.gmra.mrb[0].mxu1 %vm648_vm2, %v630_v34  ;;  %v632_v39 = vmax.f32 %v1247_v36, 0.0  ;;  %v924_v34 = vld [vmem:[%s1588_s4 + $0x20] sm:$0xff] }
  0xfc   : > { %v631_v38 = vmax.f32 %v600_v37, 0.0  ;;  %1328 = vmatpush3.bf16.msra.mxu1 %v1325_v28  ;;  %v922_v28 = vld [vmem:[%s1588_s4 + $0x10] sm:$0xff] }
  0xfd   : > { %1330 = vmatprep.subr.bf16.mxu1 %v1329_v35 }
  0xfe   : > { %v1250_v40 = vpop.f32.mrb[4].mxu0  ;;  %1265 = vmatprep.mubr.msk.f32.mxu1 %vm648_vm2, %v631_v38 }
  0xff   : > { %v610_v41 = vpop.f32.mrb[5].mxu0  ;;  %1266 = vmatmul.mubr.msk.f32.gmra.mrb[2].mxu1 %vm648_vm2, %v632_v39  ;;  %v634_v43 = vmax.f32 %v1250_v40, 0.0  ;;  %v926_v40 = vld [vmem:[%s1588_s4 + $0x30] sm:$0xff] }
 0x100   : > { %v633_v42 = vmax.f32 %v610_v41, 0.0  ;;  %1332 = vmatpush3.bf16.msra.mxu1 %v1329_v35  ;;  %v925_v35 = vld [vmem:[%s1588_s4 + $0x28] sm:$0xff] }
 0x102   : > { %v1253_v44 = vpop.f32.mrb[6].mxu0  ;;  %1268 = vmatprep.mubr.msk.f32.mxu1 %vm648_vm2, %v633_v42  ;;  %v927_v42 = vld [vmem:[%s1588_s4 + $0x38] sm:$0xff] }
 0x103   : > { %v620_v45 = vpop.f32.mrb[7].mxu0  ;;  %1269 = vmatmul.mubr.msk.f32.gmra.mrb[4].mxu1 %vm648_vm2, %v634_v43  ;;  %v636_v47 = vmax.f32 %v1253_v44, 0.0 }
 0x104   : > { %v635_v46 = vmax.f32 %v620_v45, 0.0 }
 0x106   : > { %1271 = vmatprep.mubr.msk.f32.mxu1 %vm648_vm2, %v635_v46 }
 0x107   : > { %1272 = vmatmul.mubr.msk.f32.gmra.mrb[6].mxu1 %vm648_vm2, %v636_v47 }
 0x1ce   : > { %v1264_v49 = vpop.f32.mrb[0].mxu1 }
 0x1cf   : > { %v745_v50 = vadd.f32 %v1264_v49, %v1152_v48  ;;  %v739_v51 = vpop.f32.mrb[1].mxu1 }
 0x1d0   : > { %v740_v52 = vadd.f32 %v1152_v48, %v739_v51 }
 0x1d1   : > { %v779_v55 = vmax.f32 %v745_v50, 0.0 }
 0x1d2   : > { %v778_v53 = vmax.f32 %v740_v52, 0.0  ;;  %v1267_v54 = vpop.f32.mrb[2].mxu1 }
 0x1d3   : > { %v755_v56 = vadd.f32 %v1267_v54, %v1152_v48  ;;  %v749_v57 = vpop.f32.mrb[3].mxu1 }
 0x1d4   : > { %v750_v58 = vadd.f32 %v1152_v48, %v749_v57  ;;  %1282 = vmatprep.mubr.msk.f32.mxu1 %vm648_vm2, %v778_v53 }
 0x1d5   : > { %1283 = vmatmul.mubr.msk.f32.vlgmr.msra.gmra.mrb[8].mxu1 %vm648_vm2, %v779_v55  ;;  %v781_v61 = vmax.f32 %v755_v56, 0.0 }
 0x1d6   : > { %v780_v59 = vmax.f32 %v750_v58, 0.0  ;;  %v1270_v60 = vpop.f32.mrb[4].mxu1 }
 0x1d7   : > { %v765_v62 = vadd.f32 %v1270_v60, %v1152_v48  ;;  %v759_v63 = vpop.f32.mrb[5].mxu1 }
 0x1d8   : > { %v760_v0 = vadd.f32 %v1152_v48, %v759_v63  ;;  %1285 = vmatprep.mubr.msk.f32.mxu1 %vm648_vm2, %v780_v59 }
 0x1d9   : > { %1286 = vmatmul.mubr.msk.f32.gmra.mrb[10].mxu1 %vm648_vm2, %v781_v61  ;;  %v783_v3 = vmax.f32 %v765_v62, 0.0 }
 0x1da   : > { %v782_v1 = vmax.f32 %v760_v0, 0.0  ;;  %v1273_v2 = vpop.f32.mrb[6].mxu1 }
 0x1db   : > { %v775_v4 = vadd.f32 %v1273_v2, %v1152_v48  ;;  %v769_v5 = vpop.f32.mrb[7].mxu1 }
 0x1dc   : > { %v770_v6 = vadd.f32 %v1152_v48, %v769_v5  ;;  %1288 = vmatprep.mubr.msk.f32.mxu1 %vm648_vm2, %v782_v1  ;;  %v919_v48 = vld [vmem:[%s1587_s3] sm:$0xff] }
 0x1dd   : > { %1289 = vmatmul.mubr.msk.f32.gmra.mrb[12].mxu1 %vm648_vm2, %v783_v3  ;;  %v785_v8 = vmax.f32 %v775_v4, 0.0 }
 0x1de   : > { %v784_v7 = vmax.f32 %v770_v6, 0.0 }
 0x1e0   : > { %1291 = vmatprep.mubr.msk.f32.mxu1 %vm648_vm2, %v784_v7 }
 0x1e1   : > { %1292 = vmatmul.mubr.msk.f32.gmra.mrb[14].mxu1 %vm648_vm2, %v785_v8 }
 0x2a8   : > { %v1284_v10 = vpop.f32.mrb[8].mxu1 }
 0x2a9   : > { %v880_v11 = vpop.f32.mrb[9].mxu1 }
 0x2aa   : > { %930 = vperm.xlu0 %1365, %v880_v11  }
 0x2ac   : > { %v1287_v12 = vpop.f32.mrb[10].mxu1 }
 0x2ad   : > { %945 = vperm.xlu1 %1366, %v1287_v12   ;;  %v890_v13 = vpop.f32.mrb[11].mxu1 }
 0x2ae   : > { %935 = vperm.xlu0 %1365, %v1284_v10  }
 0x2b0   : > { %v1290_v14 = vpop.f32.mrb[12].mxu1 }
 0x2b1   : > { %940 = vperm.xlu1 %1366, %v890_v13   ;;  %v900_v15 = vpop.f32.mrb[13].mxu1 }
 0x2b2   : > { %950 = vperm.xlu0 %1365, %v900_v15  }
 0x2b4   : > { %v1293_v17 = vpop.f32.mrb[14].mxu1 }
 0x2b5   : > { %955 = vperm.xlu1 %1366, %v1290_v14   ;;  %v910_v18 = vpop.f32.mrb[15].mxu1 }
 0x2b6   : > { %960 = vperm.xlu0 %1365, %v910_v18  }
 0x2b9   : > { %965 = vperm.xlu1 %1366, %v1293_v17  }
 0x329   : > { %v931_v20 = vpop.permute.xlu0 %930 }
 0x32a   : > { %v968_v25 = vmul.f32 %v931_v20, %v920_v21 }
 0x32c   : > { %v946_v23 = vpop.permute.xlu1 %945 }
 0x32d   : > { %v936_v24 = vpop.permute.xlu0 %935  ;;  %v971_v31 = vmul.f32 %v946_v23, %v923_v26 }
 0x32e   : > { %v969_v27 = vmul.f32 %v936_v24, %v921_v22 }
 0x330   : > { %v1334_v29 = vpack.c.bf16 %v969_v27, %v968_v25  ;;  %v941_v30 = vpop.permute.xlu1 %940 }
 0x331   : > { %v970_v32 = vmul.f32 %v941_v30, %v922_v28  ;;  %v951_v33 = vpop.permute.xlu0 %950 }
 0x332   : > { %1335 = vmatpush3.bf16.msra.mxu0 %v1334_v29  ;;  %v972_v38 = vmul.f32 %v951_v33, %v924_v34 }
 0x333   : > { %v1337_v36 = vpack.c.bf16 %v971_v31, %v970_v32  ;;  %1336 = vmatprep.subr.bf16.mxu0 %v1380_v16 }
 0x334   : > { %v956_v37 = vpop.permute.xlu1 %955 }
 0x335   : > { %v973_v39 = vmul.f32 %v956_v37, %v925_v35  ;;  %v961_v41 = vpop.permute.xlu0 %960 }
 0x336   : > { %1338 = vmatpush3.bf16.msra.mxu0 %v1337_v36  ;;  %v974_v45 = vmul.f32 %v961_v41, %v926_v40 }
 0x337   : > { %v1340_v43 = vpack.c.bf16 %v973_v39, %v972_v38  ;;  %1339 = vmatprep.subr.bf16.mxu0 %v1380_v16 }
 0x338   : > { %v966_v44 = vpop.permute.xlu1 %965 }
 0x339   : > { %v975_v46 = vmul.f32 %v966_v44, %v927_v42 }
 0x33a   : > { %1341 = vmatpush3.bf16.msra.mxu0 %v1340_v43 }
 0x33b   : > { %v1343_v47 = vpack.c.bf16 %v975_v46, %v974_v45  ;;  %1342 = vmatprep.subr.bf16.mxu0 %v1380_v16 }
 0x33e   : > { %1344 = vmatpush3.bf16.msra.mxu0 %v1343_v47 }
 0x341   : > { %1311 = vmatmul.mubr.msk.f32.vlgmr.msra.gmra.mrb[8].mxu0 %vm976_vm4, %v919_v48 }
 0x414   : > { %v1046_v49 = vpop.f32.mrb[8].mxu0 }
 0x415   : > { %v1312_v50 = vpop.f32.mrb[9].mxu0  ;;  %v1050_v51 = vsel %vm369_vm0, %v1046_v49, -inf }
 0x416   : > { %1051 = vmax.xlane.f32.xlu0 %v1050_v51 }
 0x4a3   : > { %v1052_v52 = vpop.xlane.xlu0 %1051 }
 0x4a4   : > { %v1053_v53 = vsub.f32 %v1046_v49, %v1052_v52 }
 0x4a6   : > { %v1054_v54 = vmul.f32 1.442695, %v1053_v53 }
 0x4a8   : > { %1367 = vpow2.f32 %v1054_v54 }
 0x4b2   : > { %v1368_v55 = vpop.eup %1367 }
 0x4b3   : > { %v1056_v56 = vsel %vm369_vm0, %v1368_v55, 0.0 }
 0x4b4   : > { %1057 = vadd.xlane.f32.xlu1 %v1056_v56 }
 0x541   : > { %v1058_v57 = vpop.xlane.xlu1 %1057 }
 0x542   : > { %1369 = vrcp.f32 %v1058_v57 }
 0x54c   : > { %v1370_v58 = vpop.eup %1369 }
 0x54d   : > { %v1060_v59 = vmul.f32 %v1370_v58, %v1368_v55 }
 0x54f   : > { %1061 = vst.msk [vmem:[%s349_s25] sm:$0xff] %vm369_vm0, %v1060_v59 }
 0x550 PF: > { %s19_s30 = sadd.s32 1, %s1377_s30  }
 0x551   : > { %p16_p5 = scmp.ge.s32.totalorder %s19_s30, 4  }
 0x553   :  { %18 = sbr.rel (!%p16_p5) target bundleno = 1 (0x1), region = 89 }

</bundles_post_ra>
